<compile_context>
chip_gen: v7x
topology: tpu7x:2x2x1
jax: 0.10.0
libtpu: 0.0.40
codegen_flags: <defaults>
</compile_context>

<pallas_src>
import functools
import math

import jax
import jax.numpy as jnp
from jax.experimental import pallas as pl
from jax.experimental.pallas import tpu as pltpu

_NEG_BIG = -1e30  # finite "-inf": keeps exp()/max() NaN-free in online softmax


def _round_up(n, m):
    return ((n + m - 1) // m) * m


def _pad_cols(w, b, target):
    """Zero-pad the last dim of weight (d_in, d) and bias to `target` columns."""
    d = w.shape[-1]
    b = jnp.asarray(b).reshape(1, d)
    if d == target:
        return w, b
    pad = ((0, 0), (0, target - d))
    return jnp.pad(w, pad), jnp.pad(b, pad)


# --------------------------------------------------------------------------
# Pass 1: fused QKV projection (weights resident, x streamed once).
# --------------------------------------------------------------------------
def _qkv_proj_kernel(x_ref, wq_ref, bq_ref, wk_ref, bk_ref, wv_ref, bv_ref,
                     q_ref, k_ref, v_ref):
    x = x_ref[...]                                            # (ts, d_model) bf16
    q = jnp.dot(x, wq_ref[...], preferred_element_type=jnp.float32) + bq_ref[...]
    k = jnp.dot(x, wk_ref[...], preferred_element_type=jnp.float32) + bk_ref[...]
    v = jnp.dot(x, wv_ref[...], preferred_element_type=jnp.float32) + bv_ref[...]
    q_ref[...] = q.astype(q_ref.dtype)
    k_ref[...] = k.astype(k_ref.dtype)
    v_ref[...] = v.astype(v_ref.dtype)


# --------------------------------------------------------------------------
# Pass 2: flash attention over precomputed Q / K / V.
# --------------------------------------------------------------------------
def _flash_attn_kernel(q_ref, k_ref, v_ref, o_ref,
                       m_scr, l_scr, acc_scr, *, causal, tile_q, tile_k):
    qi = pl.program_id(1)
    ki = pl.program_id(2)

    @pl.when(ki == 0)
    def _init():
        m_scr[...] = jnp.full(m_scr.shape, _NEG_BIG, dtype=m_scr.dtype)
        l_scr[...] = jnp.zeros(l_scr.shape, dtype=l_scr.dtype)
        acc_scr[...] = jnp.zeros(acc_scr.shape, dtype=acc_scr.dtype)

    def _tile(apply_mask):
        k = k_ref[...]                                        # (tk, d_k) bf16
        v = v_ref[...]                                        # (tk, d_v) bf16
        # Scores: contract last dims directly (K stays in natural layout, no
        # transpose / XLU copy).  1/sqrt(d_k) already folded into Q.
        s = jax.lax.dot_general(q_ref[...], k, (((1,), (1,)), ((), ())),
                                preferred_element_type=jnp.float32)  # (tq, tk)
        if apply_mask:
            row = qi * tile_q + jax.lax.broadcasted_iota(
                jnp.int32, (tile_q, tile_k), 0)
            col = ki * tile_k + jax.lax.broadcasted_iota(
                jnp.int32, (tile_q, tile_k), 1)
            s = jnp.where(col <= row, s, _NEG_BIG)

        m_prev = m_scr[...]
        m_new = jnp.maximum(m_prev, jnp.max(s, axis=-1, keepdims=True))
        alpha = jnp.exp(m_prev - m_new)
        p = jnp.exp(s - m_new)                                # f32 (v5e-safe)
        l_scr[...] = alpha * l_scr[...] + jnp.sum(p, axis=-1, keepdims=True)
        acc_scr[...] = alpha * acc_scr[...] + jnp.dot(
            p.astype(v.dtype), v, preferred_element_type=jnp.float32)
        m_scr[...] = m_new

    if causal:
        # Tile has any unmasked element at all (else skip compute entirely;
        # its DMA is already elided by the clamped kv index_map).
        valid = ki * tile_k < (qi + 1) * tile_q
        # Tile straddles the diagonal -> mask needed; interior tiles skip the
        # iota/compare/select work.
        straddles = (ki + 1) * tile_k > qi * tile_q + 1
        pl.when(jnp.logical_and(valid, straddles))(lambda: _tile(True))
        pl.when(jnp.logical_and(valid, jnp.logical_not(straddles)))(
            lambda: _tile(False))
    else:
        _tile(False)

    @pl.when(ki == pl.num_programs(2) - 1)
    def _finalize():
        # Exact divide (fully-masked rows are impossible with the causal mask;
        # with mask=None l > 0 always).
        o_ref[...] = (acc_scr[...] / l_scr[...]).astype(o_ref.dtype)


# --------------------------------------------------------------------------
# Wrapper
# --------------------------------------------------------------------------
def single_headed_attention(x, wq, bq, wk, bk, wv, bv, *, causal=True,
                            max_tile_q=512, max_tile_k=256, max_tile_proj=256):
    """x: (B, S, d_model); w*: (d_model, d_*); b*: (d_*,) or (1, d_*)."""
    B, S, d_model = x.shape
    d_k = wq.shape[1]
    d_v = wv.shape[1]
    out_dtype = x.dtype

    # Lane-dense layout: pad head dims to multiples of 128.  Padded weight /
    # bias columns are zero, so Q/K/V padded columns are zero, the scores and
    # softmax are unchanged, and padded output columns are exactly zero.
    d_kp = _round_up(d_k, 128)
    d_vp = _round_up(d_v, 128)

    scale = 1.0 / math.sqrt(d_k)                      # true d_k, not padded
    wq_p, bq_p = _pad_cols(jnp.asarray(wq) * scale,
                           jnp.asarray(bq) * scale, d_kp)
    wk_p, bk_p = _pad_cols(jnp.asarray(wk), jnp.asarray(bk), d_kp)
    wv_p, bv_p = _pad_cols(jnp.asarray(wv), jnp.asarray(bv), d_vp)

    x_bf = x.astype(jnp.bfloat16)
    wq_bf = wq_p.astype(jnp.bfloat16)
    wk_bf = wk_p.astype(jnp.bfloat16)
    wv_bf = wv_p.astype(jnp.bfloat16)
    bq_f = bq_p.astype(jnp.float32)
    bk_f = bk_p.astype(jnp.float32)
    bv_f = bv_p.astype(jnp.float32)

    # ---------------- pass 1: fused QKV projection ----------------
    ts = min(S, max_tile_proj)
    assert S % ts == 0, "S must be divisible by the projection tile size"

    q, k, v = pl.pallas_call(
        _qkv_proj_kernel,
        out_shape=(
            jax.ShapeDtypeStruct((B, S, d_kp), jnp.bfloat16),
            jax.ShapeDtypeStruct((B, S, d_kp), jnp.bfloat16),
            jax.ShapeDtypeStruct((B, S, d_vp), jnp.bfloat16),
        ),
        grid_spec=pltpu.PrefetchScalarGridSpec(
            num_scalar_prefetch=0,
            grid=(B, S // ts),
            in_specs=[
                pl.BlockSpec((pl.Squeezed(), ts, d_model),
                             lambda b, si: (b, si, 0)),                 # x
                pl.BlockSpec((d_model, d_kp), lambda b, si: (0, 0)),    # wq
                pl.BlockSpec((1, d_kp), lambda b, si: (0, 0)),          # bq
                pl.BlockSpec((d_model, d_kp), lambda b, si: (0, 0)),    # wk
                pl.BlockSpec((1, d_kp), lambda b, si: (0, 0)),          # bk
                pl.BlockSpec((d_model, d_vp), lambda b, si: (0, 0)),    # wv
                pl.BlockSpec((1, d_vp), lambda b, si: (0, 0)),          # bv
            ],
            out_specs=(
                pl.BlockSpec((pl.Squeezed(), ts, d_kp), lambda b, si: (b, si, 0)),
                pl.BlockSpec((pl.Squeezed(), ts, d_kp), lambda b, si: (b, si, 0)),
                pl.BlockSpec((pl.Squeezed(), ts, d_vp), lambda b, si: (b, si, 0)),
            ),
        ),
        compiler_params=pltpu.CompilerParams(
            dimension_semantics=("parallel", "parallel"),
            vmem_limit_bytes=40 * 1024 * 1024,
        ),
    )(x_bf, wq_bf, bq_f, wk_bf, bk_f, wv_bf, bv_f)

    # ---------------- pass 2: flash attention ----------------
    tq = min(S, max_tile_q)
    tk = min(S, max_tile_k)
    assert S % tq == 0 and S % tk == 0, "S must be divisible by the tile sizes"

    q_map = lambda b, qi, ki: (b, qi, 0)
    if causal:
        def kv_map(b, qi, ki):
            # Clamp to the last kv tile with any unmasked element for this q
            # tile; fully masked steps then repeat the previous block index so
            # Pallas elides the re-DMA.
            last_valid = ((qi + 1) * tq - 1) // tk
            return (b, jnp.minimum(ki, last_valid), 0)
    else:
        kv_map = lambda b, qi, ki: (b, ki, 0)

    kernel = functools.partial(_flash_attn_kernel, causal=causal,
                               tile_q=tq, tile_k=tk)

    out = pl.pallas_call(
        kernel,
        out_shape=jax.ShapeDtypeStruct((B, S, d_vp), out_dtype),
        grid_spec=pltpu.PrefetchScalarGridSpec(
            num_scalar_prefetch=0,
            grid=(B, S // tq, S // tk),
            in_specs=[
                pl.BlockSpec((pl.Squeezed(), tq, d_kp), q_map),   # Q
                pl.BlockSpec((pl.Squeezed(), tk, d_kp), kv_map),  # K
                pl.BlockSpec((pl.Squeezed(), tk, d_vp), kv_map),  # V
            ],
            out_specs=pl.BlockSpec((pl.Squeezed(), tq, d_vp), q_map),
            scratch_shapes=[
                pltpu.VMEM((tq, 1), jnp.float32),      # running max m
                pltpu.VMEM((tq, 1), jnp.float32),      # running denom l
                pltpu.VMEM((tq, d_vp), jnp.float32),   # output accumulator
            ],
        ),
        compiler_params=pltpu.CompilerParams(
            dimension_semantics=("parallel", "parallel", "arbitrary"),
            vmem_limit_bytes=32 * 1024 * 1024,
        ),
    )(q, k, v)

    return out[..., :d_v] if d_vp != d_v else out


# --------------------------------------------------------------------------
# Reference + test
# --------------------------------------------------------------------------
def _reference(x, wq, bq, wk, bk, wv, bv, mask=None):
    q = x @ wq + jnp.asarray(bq).reshape(1, -1)
    k = x @ wk + jnp.asarray(bk).reshape(1, -1)
    v = x @ wv + jnp.asarray(bv).reshape(1, -1)
    scores = (q @ jnp.swapaxes(k, -2, -1)) / math.sqrt(wq.shape[1])
    if mask is not None:
        scores = scores + mask
    return jax.nn.softmax(scores, axis=-1) @ v


if __name__ == "__main__":
    B, S, d_model, d_k, d_v = 2, 8, 32, 16, 16

    key = jax.random.PRNGKey(0)
    kx, kq, kbq, kk, kbk, kv_, kbv = jax.random.split(key, 7)

    x = jax.random.normal(kx, (B, S, d_model), dtype=jnp.float32)

    # Deterministic init mirroring torch.nn.Linear's U(-1/sqrt(fan_in), ...)
    bound = 1.0 / math.sqrt(d_model)
    wq = jax.random.uniform(kq, (d_model, d_k), jnp.float32, -bound, bound)
    bq = jax.random.uniform(kbq, (1, d_k), jnp.float32, -bound, bound)
    wk = jax.random.uniform(kk, (d_model, d_k), jnp.float32, -bound, bound)
    bk = jax.random.uniform(kbk, (1, d_k), jnp.float32, -bound, bound)
    wv = jax.random.uniform(kv_, (d_model, d_v), jnp.float32, -bound, bound)
    bv = jax.random.uniform(kbv, (1, d_v), jnp.float32, -bound, bound)

    # --- causal (module called with the additive -inf causal mask) ---
    out_c = single_headed_attention(x, wq, bq, wk, bk, wv, bv, causal=True)
    out_c = jax.block_until_ready(out_c)
    causal_mask = jnp.where(jnp.tril(jnp.ones((S, S), dtype=bool)), 0.0, -jnp.inf)
    ref_c = _reference(x, wq, bq, wk, bk, wv, bv,
                       jnp.broadcast_to(causal_mask, (B, S, S)).astype(jnp.float32))
    assert out_c.shape == (B, S, d_v)
    # bf16 MXU operands -> relaxed tolerance vs f32 reference.
    assert jnp.allclose(out_c, ref_c, atol=3e-2, rtol=3e-2), (
        "causal mismatch vs reference: max abs diff "
        f"{jnp.max(jnp.abs(out_c - ref_c)):.3e}")

    # --- no mask (module called with mask=None) ---
    out_n = single_headed_attention(x, wq, bq, wk, bk, wv, bv, causal=False)
    out_n = jax.block_until_ready(out_n)
    ref_n = _reference(x, wq, bq, wk, bk, wv, bv, None)
    assert out_n.shape == (B, S, d_v)
    assert jnp.allclose(out_n, ref_n, atol=3e-2, rtol=3e-2), (
        "no-mask mismatch vs reference: max abs diff "
        f"{jnp.max(jnp.abs(out_n - ref_n)):.3e}")

    print("KERNEL_OK")
</pallas_src>

<mosaic_0001>
module attributes {stable_mosaic.version = 11 : i64} {
  func.func @_qkv_proj_kernel(%arg0: i32, %arg1: i32, %arg2: memref<1x8x32xbf16, #tpu.memory_space<vmem>>, %arg3: memref<32x128xbf16, #tpu.memory_space<vmem>>, %arg4: memref<1x128xf32, #tpu.memory_space<vmem>>, %arg5: memref<32x128xbf16, #tpu.memory_space<vmem>>, %arg6: memref<1x128xf32, #tpu.memory_space<vmem>>, %arg7: memref<32x128xbf16, #tpu.memory_space<vmem>>, %arg8: memref<1x128xf32, #tpu.memory_space<vmem>>, %arg9: memref<1x8x128xbf16, #tpu.memory_space<vmem>>, %arg10: memref<1x8x128xbf16, #tpu.memory_space<vmem>>, %arg11: memref<1x8x128xbf16, #tpu.memory_space<vmem>>) attributes {dimension_semantics = [#tpu.dimension_semantics<parallel>, #tpu.dimension_semantics<parallel>], iteration_bounds = array<i64: 2, 1>, scalar_prefetch = 0 : i64, scratch_operands = 0 : i64, tpu.core_type = #tpu.core_type<tc>, window_params = [{transform_indices = @transform_0, window_bounds = array<i64: 1, 8, 32>}, {pipeline_mode = #tpu.pipeline_mode<synchronous>, transform_indices = @transform_1, window_bounds = array<i64: 32, 128>}, {pipeline_mode = #tpu.pipeline_mode<synchronous>, transform_indices = @transform_2, window_bounds = array<i64: 1, 128>}, {pipeline_mode = #tpu.pipeline_mode<synchronous>, transform_indices = @transform_3, window_bounds = array<i64: 32, 128>}, {pipeline_mode = #tpu.pipeline_mode<synchronous>, transform_indices = @transform_4, window_bounds = array<i64: 1, 128>}, {pipeline_mode = #tpu.pipeline_mode<synchronous>, transform_indices = @transform_5, window_bounds = array<i64: 32, 128>}, {pipeline_mode = #tpu.pipeline_mode<synchronous>, transform_indices = @transform_6, window_bounds = array<i64: 1, 128>}, {transform_indices = @transform_7, window_bounds = array<i64: 1, 8, 128>}, {transform_indices = @transform_8, window_bounds = array<i64: 1, 8, 128>}, {transform_indices = @transform_9, window_bounds = array<i64: 1, 8, 128>}]} {
    %c0 = arith.constant 0 : index
    %c0_0 = arith.constant 0 : index
    %c0_1 = arith.constant 0 : index
    %0 = vector.load %arg2[%c0, %c0_0, %c0_1] : memref<1x8x32xbf16, #tpu.memory_space<vmem>>, vector<1x8x32xbf16>
    %1 = vector.shape_cast %0 : vector<1x8x32xbf16> to vector<8x32xbf16>
    %c0_2 = arith.constant 0 : index
    %c0_3 = arith.constant 0 : index
    %2 = vector.load %arg3[%c0_2, %c0_3] : memref<32x128xbf16, #tpu.memory_space<vmem>>, vector<32x128xbf16>
    %cst = arith.constant dense<0.000000e+00> : vector<8x128xf32>
    %3 = tpu.matmul %1, %2, %cst {dimension_numbers = #tpu.dot_dimension_numbers<[1], [0], [0], [1], [0, 0, 1, 1], [], []>} : vector<8x32xbf16>, vector<32x128xbf16>, vector<8x128xf32> -> vector<8x128xf32>
    %c0_4 = arith.constant 0 : index
    %c0_5 = arith.constant 0 : index
    %4 = vector.load %arg4[%c0_4, %c0_5] : memref<1x128xf32, #tpu.memory_space<vmem>>, vector<1x128xf32>
    %5 = vector.broadcast %4 : vector<1x128xf32> to vector<8x128xf32>
    %6 = arith.addf %3, %5 : vector<8x128xf32>
    %c0_6 = arith.constant 0 : index
    %c0_7 = arith.constant 0 : index
    %7 = vector.load %arg5[%c0_6, %c0_7] : memref<32x128xbf16, #tpu.memory_space<vmem>>, vector<32x128xbf16>
    %cst_8 = arith.constant dense<0.000000e+00> : vector<8x128xf32>
    %8 = tpu.matmul %1, %7, %cst_8 {dimension_numbers = #tpu.dot_dimension_numbers<[1], [0], [0], [1], [0, 0, 1, 1], [], []>} : vector<8x32xbf16>, vector<32x128xbf16>, vector<8x128xf32> -> vector<8x128xf32>
    %c0_9 = arith.constant 0 : index
    %c0_10 = arith.constant 0 : index
    %9 = vector.load %arg6[%c0_9, %c0_10] : memref<1x128xf32, #tpu.memory_space<vmem>>, vector<1x128xf32>
    %10 = vector.broadcast %9 : vector<1x128xf32> to vector<8x128xf32>
    %11 = arith.addf %8, %10 : vector<8x128xf32>
    %c0_11 = arith.constant 0 : index
    %c0_12 = arith.constant 0 : index
    %12 = vector.load %arg7[%c0_11, %c0_12] : memref<32x128xbf16, #tpu.memory_space<vmem>>, vector<32x128xbf16>
    %cst_13 = arith.constant dense<0.000000e+00> : vector<8x128xf32>
    %13 = tpu.matmul %1, %12, %cst_13 {dimension_numbers = #tpu.dot_dimension_numbers<[1], [0], [0], [1], [0, 0, 1, 1], [], []>} : vector<8x32xbf16>, vector<32x128xbf16>, vector<8x128xf32> -> vector<8x128xf32>
    %c0_14 = arith.constant 0 : index
    %c0_15 = arith.constant 0 : index
    %14 = vector.load %arg8[%c0_14, %c0_15] : memref<1x128xf32, #tpu.memory_space<vmem>>, vector<1x128xf32>
    %15 = vector.broadcast %14 : vector<1x128xf32> to vector<8x128xf32>
    %16 = arith.addf %13, %15 : vector<8x128xf32>
    %17 = arith.truncf %6 : vector<8x128xf32> to vector<8x128xbf16>
    %c0_16 = arith.constant 0 : index
    %c0_17 = arith.constant 0 : index
    %c0_18 = arith.constant 0 : index
    %18 = vector.load %arg9[%c0_16, %c0_17, %c0_18] : memref<1x8x128xbf16, #tpu.memory_space<vmem>>, vector<1x8x128xbf16>
    %19 = vector.shape_cast %18 : vector<1x8x128xbf16> to vector<8x128xbf16>
    %20 = vector.shape_cast %17 : vector<8x128xbf16> to vector<1x8x128xbf16>
    tpu.vector_store %arg9[%c0_16, %c0_17, %c0_18], %20 {strides = array<i32>} : memref<1x8x128xbf16, #tpu.memory_space<vmem>>, vector<1x8x128xbf16>,
    %21 = arith.truncf %11 : vector<8x128xf32> to vector<8x128xbf16>
    %c0_19 = arith.constant 0 : index
    %c0_20 = arith.constant 0 : index
    %c0_21 = arith.constant 0 : index
    %22 = vector.load %arg10[%c0_19, %c0_20, %c0_21] : memref<1x8x128xbf16, #tpu.memory_space<vmem>>, vector<1x8x128xbf16>
    %23 = vector.shape_cast %22 : vector<1x8x128xbf16> to vector<8x128xbf16>
    %24 = vector.shape_cast %21 : vector<8x128xbf16> to vector<1x8x128xbf16>
    tpu.vector_store %arg10[%c0_19, %c0_20, %c0_21], %24 {strides = array<i32>} : memref<1x8x128xbf16, #tpu.memory_space<vmem>>, vector<1x8x128xbf16>,
    %25 = arith.truncf %16 : vector<8x128xf32> to vector<8x128xbf16>
    %c0_22 = arith.constant 0 : index
    %c0_23 = arith.constant 0 : index
    %c0_24 = arith.constant 0 : index
    %26 = vector.load %arg11[%c0_22, %c0_23, %c0_24] : memref<1x8x128xbf16, #tpu.memory_space<vmem>>, vector<1x8x128xbf16>
    %27 = vector.shape_cast %26 : vector<1x8x128xbf16> to vector<8x128xbf16>
    %28 = vector.shape_cast %25 : vector<8x128xbf16> to vector<1x8x128xbf16>
    tpu.vector_store %arg11[%c0_22, %c0_23, %c0_24], %28 {strides = array<i32>} : memref<1x8x128xbf16, #tpu.memory_space<vmem>>, vector<1x8x128xbf16>,
    return
  }
  func.func @transform_0(%arg0: i32, %arg1: i32) -> (i32, i32, i32) {
    %c0_i32 = arith.constant 0 : i32
    %c0_i32_0 = arith.constant 0 : i32
    return %arg0, %arg1, %c0_i32 : i32, i32, i32
  }
  func.func @transform_1(%arg0: i32, %arg1: i32) -> (i32, i32) {
    %c0_i32 = arith.constant 0 : i32
    %c0_i32_0 = arith.constant 0 : i32
    %c0_i32_1 = arith.constant 0 : i32
    return %c0_i32, %c0_i32_0 : i32, i32
  }
  func.func @transform_2(%arg0: i32, %arg1: i32) -> (i32, i32) {
    %c0_i32 = arith.constant 0 : i32
    %c0_i32_0 = arith.constant 0 : i32
    %c0_i32_1 = arith.constant 0 : i32
    return %c0_i32, %c0_i32_0 : i32, i32
  }
  func.func @transform_3(%arg0: i32, %arg1: i32) -> (i32, i32) {
    %c0_i32 = arith.constant 0 : i32
    %c0_i32_0 = arith.constant 0 : i32
    %c0_i32_1 = arith.constant 0 : i32
    return %c0_i32, %c0_i32_0 : i32, i32
  }
  func.func @transform_4(%arg0: i32, %arg1: i32) -> (i32, i32) {
    %c0_i32 = arith.constant 0 : i32
    %c0_i32_0 = arith.constant 0 : i32
    %c0_i32_1 = arith.constant 0 : i32
    return %c0_i32, %c0_i32_0 : i32, i32
  }
  func.func @transform_5(%arg0: i32, %arg1: i32) -> (i32, i32) {
    %c0_i32 = arith.constant 0 : i32
    %c0_i32_0 = arith.constant 0 : i32
    %c0_i32_1 = arith.constant 0 : i32
    return %c0_i32, %c0_i32_0 : i32, i32
  }
  func.func @transform_6(%arg0: i32, %arg1: i32) -> (i32, i32) {
    %c0_i32 = arith.constant 0 : i32
    %c0_i32_0 = arith.constant 0 : i32
    %c0_i32_1 = arith.constant 0 : i32
    return %c0_i32, %c0_i32_0 : i32, i32
  }
  func.func @transform_7(%arg0: i32, %arg1: i32) -> (i32, i32, i32) {
    %c0_i32 = arith.constant 0 : i32
    %c0_i32_0 = arith.constant 0 : i32
    return %arg0, %arg1, %c0_i32 : i32, i32, i32
  }
  func.func @transform_8(%arg0: i32, %arg1: i32) -> (i32, i32, i32) {
    %c0_i32 = arith.constant 0 : i32
    %c0_i32_0 = arith.constant 0 : i32
    return %arg0, %arg1, %c0_i32 : i32, i32, i32
  }
  func.func @transform_9(%arg0: i32, %arg1: i32) -> (i32, i32, i32) {
    %c0_i32 = arith.constant 0 : i32
    %c0_i32_0 = arith.constant 0 : i32
    return %arg0, %arg1, %c0_i32 : i32, i32, i32
  }
}

</mosaic_0001>

<bundles_post_ra>
// kernel: tpu_custom_call.1
= control target key start
LH: loop header
LB: loop body
LE: loop exit
PB: predicated region body
PF: predicated region fallthrough
CT: control target
= control target key end

     0   :  { %s1644_s0 = inlined_call_operand.hbm [shape: bf16[2,8,32], index: 0, kind: input, shape index: {}]   ;;  %s1645_s1 = inlined_call_operand.hbm [shape: bf16[32,128], index: 1, kind: input, shape index: {}]   ;;  %s1646_s2 = inlined_call_operand.vmem [shape: f32[1,128], index: 2, kind: input, shape index: {}]   ;;  %s1647_s3 = inlined_call_operand.hbm [shape: bf16[32,128], index: 3, kind: input, shape index: {}]   ;;  %s1648_s4 = inlined_call_operand.vmem [shape: f32[1,128], index: 4, kind: input, shape index: {}]   ;;  %s1649_s5 = inlined_call_operand.vmem [shape: bf16[32,128], index: 5, kind: input, shape index: {}]   ;;  %s1650_s6 = inlined_call_operand.vmem [shape: f32[1,128], index: 6, kind: input, shape index: {}]   ;;  %s1651_s7 = inlined_call_operand.hbm [shape: bf16[2,8,128], index: 7, kind: output, shape index: {0}]   ;;  %s1652_s8 = inlined_call_operand.hbm [shape: bf16[2,8,128], index: 8, kind: output, shape index: {1}]   ;;  %s1653_s9 = inlined_call_operand.hbm [shape: bf16[2,8,128], index: 9, kind: output, shape index: {2}]  }
   0x1   :  { %1662 = sst [smem:[#allocation18_spill]] %s1644_s0 }
   0x2   :  { %1663 = sst [smem:[#allocation19_spill]] %s1645_s1 }
   0x3   :  { %1664 = sst [smem:[#allocation20_spill]] %s1653_s9 }
   0x4   :  { %15 = vsyncpa [#allocation3], 0 }
   0x5   :  { %17 = vsyncpa [#allocation3 + $0x1], 0 }
   0x6   :  { %18 = vsyncpa [#allocation6], 0 }
   0x7   :  { %19 = vsyncpa [#allocation4], 0 }
   0x8   :  { %21 = vsyncpa [#allocation4 + $0x1], 0 }
   0x9   :  { %22 = vsyncpa [#allocation10], 0 }
   0xa   :  { %24 = vsyncpa [#allocation10 + $0x1], 0  ;;  %s1297_s30 = smov 0   ;;  %s1299_s10 = smov 0  }
   0xb   :  { %s1301_s11 = smov 0   ;;  %s1303_s12 = smov 0  }
   0xc   :  { %s1305_s13 = smov 0   ;;  %s1307_s14 = smov 0  }
   0xd LB: > { %1665 = sst [smem:[#allocation16_spill]] %s1215_s30  ;;  %s1328_s15 = sadd.s32 4294967295, %s1235_s14   ;;  %s1235_s14 = sphi %s1307_s14, %s30_s14   ;;  %s1231_s13 = sphi %s1305_s13, %s1693_s13   ;;  %s1227_s12 = sphi %s1303_s12, %s1692_s12   ;;  %s1223_s11 = sphi %s1301_s11, %s1691_s11   ;;  %s1219_s10 = sphi %s1299_s10, %s1690_s10   ;;  %s1215_s30 = sphi %s1297_s30, %s1689_s30  }
   0xe   : > { %s1654_s16 = sadd.s32 4294967294, %s1235_s14   ;;  %p64_p0 = scmp.ne.s32.totalorder %s1219_s10, %s1215_s30 }
   0xf   : > { %p1655_p1 = scmp.eq.s32.totalorder %s1328_s15, 0  ;;  %p222_p3 = scmp.eq.s32.totalorder %s1654_s16, 1 }
  0x10   : > { %p834_p5 = scmp.ge.s32.totalorder %s1235_s14, 1  ;;  %p285_p7 = scmp.lt.s32.totalorder %s1235_s14, 3 }
  0x11   : > { %p1339_p4 = por %p1655_p1, %p64_p0  ;;  %p1344_p6 = por %p222_p3, %p64_p0 }
  0x12   : > { %p1349_p8 = pnand %p834_p5, %p285_p7  ;;  %s1237_s20 = smov [#allocation5]  }
  0x13   : > { %s1666_s17 = scalar_select %p1339_p4, 1, 0 }
  0x14   : > { %s1667_s18 = scalar_select %p1344_p6, 1, 0 }
  0x15   : > { %s297_s21 = sshll.u32 %s1237_s20, 4  ;;  %p916_p9 = pneg %p1349_p8  ;;  %s1353_s21 = int_to_ptr.vmem [resolvable:$true] %s297_s21 }
  0x16   : > { %1668 = sst [smem:[#allocation17_spill]] %s1667_s18  ;;  %s1238_s23 = smov [#allocation7]  }
  0x17   : > { %p1360_p11 = pnand %p916_p9, %p1655_p1  ;;  %s313_s24 = sshll.u32 %s1238_s23, 4  ;;  %s1364_s24 = int_to_ptr.vmem [resolvable:$true] %s313_s24 }
  0x18   : > { %s1671_s1 = sld [smem:[#allocation19_spill]] }
  0x19   : > { %p1005_p13 = pneg %p1360_p11 }
  0x1e   : > { %s1003_s27 = scalar_lea.hbm %s1671_s1, 256 }
  0x1f   : > { %p1004_p12 = scmp.ne.s32.totalorder %s1671_s1, %s1003_s27  ;;  %p1010_p5 = scmp.lt.u32.totalorder %s1003_s27, %s1671_s1 }
  0x21   : > { %p1006_p0 = pnand %p1005_p13, %p1004_p12 }
  0x23   : > { %p1007_p3 = pneg %p1006_p0 }
  0x25   : > { %p1012_p7 = pnand %p1010_p5, %p1007_p3 }
  0x27   : > { %1015 = shalt.err (!%p1012_p7)
}
  0x28   : > { %s1016_s23 = scalar_lea.vmem %s1353_s21, 256  ;;  %p1024_p2 = scmp.lt.s32.totalorder %s1353_s21, %s1353_s21 }
  0x29   : > { %p1017_p9 = scmp.ne.s32.totalorder %s1353_s21, %s1016_s23  ;;  %p1025_p12 = scmp.lt.s32.totalorder %s1016_s23, %s1016_s23 }
  0x2b   : > { %p1019_p10 = pnand %p1017_p9, %p1005_p13  ;;  %p1026_p0 = por %p1025_p12, %p1024_p2 }
  0x2d   : > { %p1020_p1 = pneg %p1019_p10 }
  0x2f   : > { %p1027_p6 = pnand %p1026_p0, %p1020_p1 }
  0x31   : > { %1030 = shalt.err (!%p1027_p6)
}
  0x32   : > { %s1239_s16 = smov 64   ;;  %s1240_s25 = smov 4  }
  0x33   : > { %919 = dma.hbm_to_vmem [thread:$0]  (!%p1360_p11), %s1671_s1, 256, %s1353_s21, [#allocation6], %s1239_s16, %s1239_s16, %s1240_s25  }
  0x34   : > { %s1031_s20 = scalar_lea.hbm %s1647_s3, 256 }
  0x35   : > { %p1032_p2 = scmp.ne.s32.totalorder %s1647_s3, %s1031_s20  ;;  %p1038_p10 = scmp.lt.u32.totalorder %s1031_s20, %s1647_s3 }
  0x37   : > { %p1034_p1 = pnand %p1032_p2, %p1005_p13 }
  0x39   : > { %p1035_p6 = pneg %p1034_p1 }
  0x3b   : > { %p1040_p3 = pnand %p1038_p10, %p1035_p6 }
  0x3d   : > { %1043 = shalt.err (!%p1040_p3)
}
  0x3e   : > { %s1044_s21 = scalar_lea.vmem %s1364_s24, 256  ;;  %p1052_p12 = scmp.lt.s32.totalorder %s1364_s24, %s1364_s24 }
  0x3f   : > { %p1045_p5 = scmp.ne.s32.totalorder %s1364_s24, %s1044_s21  ;;  %p1053_p0 = scmp.lt.s32.totalorder %s1044_s21, %s1044_s21 }
  0x41   : > { %p1047_p7 = pnand %p1045_p5, %p1005_p13  ;;  %p1054_p2 = por %p1053_p0, %p1052_p12 }
  0x43   : > { %p1048_p9 = pneg %p1047_p7 }
  0x45   : > { %p1055_p1 = pnand %p1054_p2, %p1048_p9 }
  0x47   : > { %1058 = shalt.err (!%p1055_p1)
}
  0x48   : > { %922 = dma.hbm_to_vmem [thread:$0]  (!%p1360_p11), %s1647_s3, 256, %s1364_s24, [#allocation6], %s1239_s16, %s1239_s16, %s1240_s25  }
  0x49   : > { %s42_s18 = sadd.s32 1, %s1231_s13  ;;  %s51_s26 = sadd.s32 1, %s1223_s11 }
  0x4a   : > { %p44_p13 = scmp.ge.s32.totalorder %s42_s18, 2  ;;  %p58_p6 = scmp.ne.s32.totalorder %s1223_s11, %s1219_s10 }
  0x4b   : > { %p59_p10 = scmp.eq.s32.totalorder %s1235_s14, 0  ;;  %p939_p3 = scmp.lt.s32.totalorder %s1235_s14, 2 }
  0x4c   : > { %s1695_s18 = smov (%p44_p13, %s42_s18), 0  ;;  %p1672_p7 = scmp.eq.s32.totalorder %s1328_s15, 1 }
  0x4d   : > { %p60_p5 = por %p59_p10, %p58_p6  ;;  %s46_s27 = ssub.s32 %s1231_s13, %s1695_s18 }
  0x4e   : > { %p1428_p9 = por %p1672_p7, %p58_p6  ;;  %s336_s28 = sand.u32 1, %s1223_s11  }
  0x4f   : > { %p49_p12 = scmp.eq.s32.totalorder %s46_s27, 0  ;;  %s838_s24 = sshll.u32 %s336_s28, 2 }
  0x50   : > { %s1673_s22 = scalar_select %p1428_p9, 1, 0 }
  0x51   : > { %s839_s16 = sshll.u32 %s1231_s13, 6  ;;  %s1674_s0 = sld [smem:[#allocation18_spill]] }
  0x52   : > { %s1437_s25 = scalar_select %p49_p12, %s1223_s11, %s51_s26  }
  0x53   : > { %s340_s21 = scalar_lea.vmem [#allocation2], %s838_s24  ;;  %p1446_p11 = pnand %p939_p3, %p60_p5 }
  0x54   : > { %s348_s9 = sshll.u32 %s340_s21, 4  ;;  %s337_s26 = scalar_lea.sflag [#allocation3], %s336_s28  ;;  %s1450_s9 = int_to_ptr.vmem [resolvable:$true] %s348_s9 }
  0x55   : > { %p1061_p2 = pneg %p1446_p11 }
  0x57   : > { %s1442_s23 = scalar_lea.hbm %s1674_s0, %s839_s16  ;;  %s1064_s29 = scalar_lea.hbm %s1674_s0, 128 }
  0x58   : > { %s1059_s27 = scalar_lea.hbm %s1442_s23, 64  ;;  %p1065_p6 = scmp.lt.u32.totalorder %s1442_s23, %s1674_s0 }
  0x59   : > { %p1060_p0 = scmp.ne.s32.totalorder %s1442_s23, %s1059_s27  ;;  %p1066_p10 = scmp.lt.u32.totalorder %s1064_s29, %s1059_s27 }
  0x5a   : > { %p1068_p5 = scmp.lt.u32.totalorder %s1059_s27, %s1442_s23 }
  0x5b   : > { %p1062_p1 = pnand %p1061_p2, %p1060_p0  ;;  %p1067_p3 = por %p1066_p10, %p1065_p6 }
  0x5d   : > { %p1063_p13 = pneg %p1062_p1  ;;  %p1069_p7 = por %p1068_p5, %p1067_p3 }
  0x5f   : > { %p1070_p12 = pnand %p1069_p7, %p1063_p13 }
  0x61   : > { %1073 = shalt.err (!%p1070_p12)
}
  0x62   : > { %s1074_s28 = scalar_lea.vmem %s1450_s9, 64  ;;  %s1241_s24 = smov [#allocation2]  }
  0x63   : > { %p1075_p0 = scmp.ne.s32.totalorder %s1450_s9, %s1074_s28  ;;  %s1079_s16 = sshll.u32 %s1241_s24, 4  ;;  %s1080_s16 = int_to_ptr.vmem [resolvable:$false] %s1079_s16 }
  0x64   : > { %s1081_s20 = scalar_lea.vmem %s1080_s16, 128  ;;  %p1082_p4 = scmp.lt.s32.totalorder %s1450_s9, %s1080_s16 }
  0x65   : > { %p1077_p1 = pnand %p1075_p0, %p1061_p2  ;;  %p1083_p6 = scmp.lt.s32.totalorder %s1081_s20, %s1074_s28 }
  0x67   : > { %p1078_p9 = pneg %p1077_p1  ;;  %p1084_p10 = por %p1083_p6, %p1082_p4 }
  0x69   : > { %p1085_p3 = pnand %p1084_p10, %p1078_p9 }
  0x6b   : > { %1088 = shalt.err (!%p1085_p3)
}
  0x6c   : > { %926 = dma.hbm_to_vmem [thread:$0]  (!%p1446_p11), %s1442_s23, 64, %s1450_s9, %s337_s26  }
  0x6d   : > { %357 = sbr.rel (%p1349_p8) target bundleno = 417 (0x1a1), region = 48  ;;  %s1480_s27 = sand.u32 (!%p1349_p8), 1, %s1219_s10  }
  0x6e   : > { %s1483_s29 = sshll.u32 (!%p1349_p8), %s1480_s27, 2  ;;  %s360_s21 = scalar_lea.sflag (!%p1349_p8), [#allocation3], %s1480_s27 }
  0x6f   : > { %s363_s28 = scalar_lea.vmem (!%p1349_p8), [#allocation2], %s1483_s29  ;;  %p1676_p4 = scmp.ne.s32.totalorder (!%p1349_p8), %s1666_s17, 0 }
  0x74   : > { %1198 = dma.done.wait (%p1676_p4), %s360_s21, 64  }
  0x75   : > { %1200 = vsyncadd (%p1676_p4), %s360_s21, 4294967232  ;;  %p1677_p9 = scmp.eq.s32.totalorder %s1328_s15, 0 }
  0x77   : > { %1202 = dma.done.wait (%p1677_p9), [#allocation6], 512   ;;  %p1678_p8 = pmov %p1677_p9 }
  0x78   : > { %v1242_v0 = vmov 0.0   ;;  %vm1243_vm0 = vmmov 0   ;;  %v997_v1 = vld [vmem:[#allocation5] sm:$0xff]   ;;  %v998_v2 = vld [vmem:[#allocation5 + $0x8] sm:$0xff]   ;;  %v999_v3 = vld [vmem:[#allocation7] sm:$0xff]   ;;  %vm441_vm1 = vcmask 261120  }
  0x79   : > { %1204 = vsyncadd (%p1678_p8), [#allocation6], 4294966784  ;;  %876 = vmatprep.subr.bf16.mxu0 %v1242_v0  ;;  %884 = vmatprep.subr.bf16.mxu1 %v1242_v0  ;;  %v1001_v4 = vld [vmem:[#allocation7 + $0x8] sm:$0xff]   ;;  %v1000_v6 = vld [vmem:[%s1649_s5] sm:$0xff]   ;;  %s1511_s20 = sshll.u32 %s1227_s12, 6  ;;  %s401_s21 = scalar_lea.vmem [#allocation8], %s1483_s29 }
  0x7a   : > { %880 = vmatprep.mubr.msk.bf16.mxu0 %vm1243_vm0, %v1242_v0  ;;  %888 = vmatprep.mubr.msk.bf16.mxu1 %vm1243_vm0, %v1242_v0  ;;  %v417_v5 = vld [vmem:[%s363_s28] sm:$0xf]  ;;  %v1002_v7 = vld [vmem:[%s1649_s5 + $0x8] sm:$0xff]   ;;  %v847_v8 = vld [vmem:[%s1646_s2] ss:$0 sm:$0xff]  ;;  %s642_s28 = sshll.u32 %s401_s21, 4  ;;  %s1522_s30 = scalar_lea.hbm %s1651_s7, %s1511_s20  ;;  %s1524_s28 = int_to_ptr.vmem [resolvable:$true] %s642_s28 }
  0x7b   : > { %877 = vmatpush3.bf16.msra.mxu0 %v997_v1  ;;  %885 = vmatpush3.bf16.msra.mxu1 %v999_v3  ;;  %v851_v10 = vld [vmem:[%s1648_s4] ss:$0 sm:$0xff]  ;;  %s1661_s19 = scalar_lea.vmem [#allocation9], %s1483_s29  ;;  %s1530_s16 = scalar_lea.hbm %s1652_s8, %s1511_s20 }
  0x7c   : > { %878 = vmatprep.subr.bf16.mxu0 %v1242_v0  ;;  %886 = vmatprep.subr.bf16.mxu1 %v1242_v0  ;;  %s656_s23 = sshll.u32 %s1661_s19, 4  ;;  %v855_v22 = vld [vmem:[%s1650_s6] ss:$0 sm:$0xff]  ;;  %s618_s9 = scalar_lea.sflag [#allocation4], %s1480_s27  ;;  %s1532_s23 = int_to_ptr.vmem [resolvable:$true] %s656_s23 }
  0x7d   : > { %s1089_s19 = scalar_lea.vmem %s1524_s28, 64  ;;  %p1679_p2 = scmp.ne.s32.totalorder %s1673_s22, 0 }
  0x7e   : > { %p1090_p11 = scmp.ne.s32.totalorder %s1524_s28, %s1089_s19 }
  0x7f   : > { %879 = vmatpush3.bf16.msra.mxu0 %v998_v2  ;;  %887 = vmatpush3.bf16.msra.mxu1 %v1001_v4 }
  0x80   : > { %892 = vmatprep.subr.bf16.mxu0 %v1242_v0  ;;  %p1091_p13 = pnand %p1090_p11, %p1679_p2 }
  0x82   : > { %881 = vmatmul.mubr.msk.bf16.vlgmr.msra.gmra.mrb[0].mxu0 %vm441_vm1, %v417_v5  ;;  %889 = vmatmul.mubr.msk.bf16.vlgmr.msra.gmra.mrb[0].mxu1 %vm441_vm1, %v417_v5  ;;  %p1092_p5 = pneg %p1091_p13 }
  0x83   : > { %893 = vmatpush3.bf16.msra.mxu0 %v1000_v6  ;;  %896 = vmatprep.mubr.msk.bf16.mxu0 %vm1243_vm0, %v1242_v0 }
  0x84   : > { %894 = vmatprep.subr.bf16.mxu0 %v1242_v0 }
  0x87   : > { %895 = vmatpush3.bf16.msra.mxu0 %v1002_v7 }
  0x8a   : > { %897 = vmatmul.mubr.msk.bf16.vlgmr.msra.gmra.mrb[4].mxu0 %vm441_vm1, %v417_v5 }
 0x155   : > { %v479_v9 = vpop.f32.mrb[0].mxu0  ;;  %v542_v14 = vpop.f32.mrb[0].mxu1 }
 0x156   : > { %v480_v11 = vadd.f32 %v847_v8, %v479_v9  ;;  %v882_v12 = vpop.f32.mrb[1].mxu0  ;;  %v543_v17 = vadd.f32 %v851_v10, %v542_v14  ;;  %v890_v18 = vpop.f32.mrb[1].mxu1 }
 0x157   : > { %v482_v13 = vpop.f32.mrb[2].mxu0  ;;  %v545_v19 = vpop.f32.mrb[2].mxu1 }
 0x158   : > { %v611_v15 = vpack.c.bf16 %v480_v11, %v480_v11  ;;  %v883_v16 = vpop.f32.mrb[3].mxu0  ;;  %v613_v20 = vpack.c.bf16 %v543_v17, %v543_v17  ;;  %v891_v21 = vpop.f32.mrb[3].mxu1 }
 0x15a   : > { %612 = vst [vmem:[%s401_s21] sm:$0xf] %v611_v15  ;;  %s1244_s21 = smov [#allocation8]  }
 0x15b   : > { %s1093_s0 = sshll.u32 %s1244_s21, 4  ;;  %s1094_s0 = int_to_ptr.vmem [resolvable:$false] %s1093_s0 }
 0x15c   : > { %s1095_s1 = scalar_lea.vmem %s1094_s0, 128  ;;  %p1096_p7 = scmp.lt.s32.totalorder %s1524_s28, %s1094_s0 }
 0x15d   : > { %p1097_p12 = scmp.lt.s32.totalorder %s1095_s1, %s1089_s19 }
 0x15f   : > { %p1098_p0 = por %p1097_p12, %p1096_p7 }
 0x161   : > { %p1099_p1 = pnand %p1098_p0, %p1092_p5 }
 0x163   : > { %1102 = shalt.err (!%p1099_p1)
}
 0x164   : > { %s1103_s27 = scalar_lea.hbm %s1522_s30, 64  ;;  %s1107_s24 = scalar_lea.hbm %s1651_s7, 128 }
 0x165   : > { %p1104_p6 = scmp.ne.s32.totalorder %s1522_s30, %s1103_s27  ;;  %p1108_p4 = scmp.lt.u32.totalorder %s1522_s30, %s1651_s7 }
 0x166   : > { %p1109_p9 = scmp.lt.u32.totalorder %s1107_s24, %s1103_s27  ;;  %p1111_p11 = scmp.lt.u32.totalorder %s1103_s27, %s1522_s30 }
 0x167   : > { %p1105_p10 = pnand %p1104_p6, %p1679_p2 }
 0x168   : > { %p1110_p8 = por %p1109_p9, %p1108_p4 }
 0x169   : > { %p1106_p3 = pneg %p1105_p10 }
 0x16a   : > { %p1112_p13 = por %p1111_p11, %p1110_p8 }
 0x16c   : > { %p1113_p5 = pnand %p1112_p13, %p1106_p3 }
 0x16e   : > { %1116 = shalt.err (!%p1113_p5)
}
 0x16f   : > { %910 = dma.vmem_to_hbm [thread:$0]  (%p1679_p2), %s1524_s28, 64, %s1522_s30, %s618_s9   ;;  %v605_v23 = vpop.f32.mrb[4].mxu0 }
 0x170   : > { %s1680_s1 = scalar_lea.vmem [#allocation9], %s1483_s29  ;;  %s415_s19 = scalar_lea.vmem [#allocation11], %s1483_s29 }
 0x171   : > { %614 = vst [vmem:[%s1680_s1] sm:$0xf] %v613_v20  ;;  %s1564_s21 = sshll.u32 %s415_s19, 4  ;;  %s1681_s27 = sand.u32 1, %s1328_s15   ;;  %s671_s21 = int_to_ptr.vmem [resolvable:$true] %s1564_s21 }
 0x172   : > { %s1568_s17 = scalar_lea.sflag [#allocation10], %s1681_s27  ;;  %s1117_s26 = scalar_lea.vmem %s1532_s23, 64 }
 0x173   : > { %p1118_p7 = scmp.ne.s32.totalorder %s1532_s23, %s1117_s26  ;;  %s1245_s24 = smov [#allocation9]  }
 0x174   : > { %s1121_s12 = sshll.u32 %s1245_s24, 4  ;;  %s1122_s12 = int_to_ptr.vmem [resolvable:$false] %s1121_s12 }
 0x175   : > { %p1119_p12 = pnand %p1118_p7, %p1679_p2  ;;  %s1123_s0 = scalar_lea.vmem %s1122_s12, 128 }
 0x176   : > { %p1124_p1 = scmp.lt.s32.totalorder %s1532_s23, %s1122_s12  ;;  %p1125_p6 = scmp.lt.s32.totalorder %s1123_s0, %s1117_s26 }
 0x177   : > { %p1120_p0 = pneg %p1119_p12 }
 0x178   : > { %p1126_p10 = por %p1125_p6, %p1124_p1 }
 0x17a   : > { %p1127_p3 = pnand %p1126_p10, %p1120_p0 }
 0x17c   : > { %1130 = shalt.err (!%p1127_p3)
}
 0x17d   : > { %s1131_s15 = scalar_lea.hbm %s1530_s16, 64  ;;  %s1135_s9 = scalar_lea.hbm %s1652_s8, 128 }
 0x17e   : > { %p1132_p4 = scmp.ne.s32.totalorder %s1530_s16, %s1131_s15  ;;  %p1136_p11 = scmp.lt.u32.totalorder %s1530_s16, %s1652_s8 }
 0x17f   : > { %p1137_p13 = scmp.lt.u32.totalorder %s1135_s9, %s1131_s15  ;;  %p1139_p7 = scmp.lt.u32.totalorder %s1131_s15, %s1530_s16 }
 0x180   : > { %p1133_p9 = pnand %p1132_p4, %p1679_p2 }
 0x181   : > { %p1138_p5 = por %p1137_p13, %p1136_p11 }
 0x182   : > { %p1134_p8 = pneg %p1133_p9 }
 0x183   : > { %p1140_p12 = por %p1139_p7, %p1138_p5 }
 0x185   : > { %p1141_p0 = pnand %p1140_p12, %p1134_p8 }
 0x187   : > { %1144 = shalt.err (!%p1141_p0)
}
 0x188   : > { %911 = dma.vmem_to_hbm [thread:$0]  (%p1679_p2), %s1532_s23, 64, %s1530_s16, %s1568_s17   ;;  %v606_v24 = vadd.f32 %v855_v22, %v605_v23  ;;  %v898_v25 = vpop.f32.mrb[5].mxu0 }
 0x189   : > { %v608_v26 = vpop.f32.mrb[6].mxu0  ;;  %s1682_s12 = sld [smem:[#allocation20_spill]]  ;;  %s1145_s28 = scalar_lea.vmem %s671_s21, 64 }
 0x18a   : > { %v615_v27 = vpack.c.bf16 %v606_v24, %v606_v24  ;;  %v899_v28 = vpop.f32.mrb[7].mxu0  ;;  %p1146_p1 = scmp.ne.s32.totalorder %s671_s21, %s1145_s28  ;;  %s1246_s30 = smov [#allocation11]  }
 0x18b   : > { %s1149_s23 = sshll.u32 %s1246_s30, 4  ;;  %s1150_s23 = int_to_ptr.vmem [resolvable:$false] %s1149_s23 }
 0x18c   : > { %616 = vst [vmem:[%s415_s19] sm:$0xf] %v615_v27  ;;  %p1147_p6 = pnand %p1146_p1, %p1679_p2  ;;  %s1151_s16 = scalar_lea.vmem %s1150_s23, 128 }
 0x18d   : > { %p1152_p3 = scmp.lt.s32.totalorder %s671_s21, %s1150_s23  ;;  %p1153_p4 = scmp.lt.s32.totalorder %s1151_s16, %s1145_s28 }
 0x18e   : > { %p1148_p10 = pneg %p1147_p6 }
 0x18f   : > { %s1683_s0 = smov %s1682_s12  ;;  %s1596_s15 = scalar_lea.hbm %s1682_s12, %s1511_s20 }
 0x190   : > { %p1154_p9 = por %p1153_p4, %p1152_p3 }
 0x192   : > { %p1155_p8 = pnand %p1154_p9, %p1148_p10 }
 0x194   : > { %1158 = shalt.err (!%p1155_p8)
}
 0x195   : > { %s1159_s29 = scalar_lea.hbm %s1596_s15, 64  ;;  %s1163_s9 = scalar_lea.hbm %s1683_s0, 128 }
 0x196   : > { %p1160_p11 = scmp.ne.s32.totalorder %s1596_s15, %s1159_s29  ;;  %p1164_p7 = scmp.lt.u32.totalorder %s1596_s15, %s1683_s0 }
 0x197   : > { %p1165_p12 = scmp.lt.u32.totalorder %s1163_s9, %s1159_s29  ;;  %p1167_p1 = scmp.lt.u32.totalorder %s1159_s29, %s1596_s15 }
 0x198   : > { %p1161_p13 = pnand %p1160_p11, %p1679_p2 }
 0x199   : > { %p1166_p0 = por %p1165_p12, %p1164_p7 }
 0x19a   : > { %p1162_p5 = pneg %p1161_p13 }
 0x19b   : > { %p1168_p6 = por %p1167_p1, %p1166_p0 }
 0x19d   : > { %p1169_p10 = pnand %p1168_p6, %p1162_p5 }
 0x19f   : > { %1172 = shalt.err (!%p1169_p10)
}
 0x1a0   : > { %912 = dma.vmem_to_hbm [thread:$0]  (%p1679_p2), %s671_s21, 64, %s1596_s15, %s1568_s17  }
 0x1a1 PF: > { %s1684_s26 = sld [smem:[#allocation16_spill]]  ;;  %s1685_s24 = sld [smem:[#allocation17_spill]] }
 0x1a2   : > { %p1687_p4 = scmp.ge.s32.totalorder %s1235_s14, 2 }
 0x1a7   : > { %s682_s12 = sand.u32 1, %s1684_s26   ;;  %p1686_p3 = scmp.ne.s32.totalorder %s1685_s24, 0 }
 0x1a8   : > { %s683_s28 = scalar_lea.sflag [#allocation4], %s682_s12 }
 0x1a9   : > { %p928_p9 = pnand %p1687_p4, %p1686_p3 }
 0x1ab   : > { %1206 = dma.done.wait (!%p928_p9), %s683_s28, 64  }
 0x1ac   : > { %1208 = vsyncadd (!%p928_p9), %s683_s28, 4294967232  ;;  %s1688_s30 = sadd.s32 4294967294, %s1235_s14  }
 0x1ad   : > { %s691_s23 = sand.u32 1, %s1688_s30  }
 0x1ae   : > { %s692_s16 = scalar_lea.sflag [#allocation10], %s691_s23 }
 0x1af   : > { %1210 = dma.done.wait (!%p928_p9), %s692_s16, 128  }
 0x1b0   : > { %1212 = vsyncadd (!%p928_p9), %s692_s16, 4294967168  ;;  %s30_s14 = sadd.s32 1, %s1235_s14   ;;  %s1689_s30 = smov %s1219_s10 }
 0x1b1   : > { %p27_p2 = scmp.ge.s32.totalorder %s30_s14, 4   ;;  %s1690_s10 = smov %s1223_s11 }
 0x1b2   : > { %s1691_s11 = smov %s1437_s25  ;;  %s1692_s12 = smov %s1231_s13 }
 0x1b3   : > { %s1693_s13 = smov %s1695_s18  ;;  %29 = sbr.rel (!%p27_p2) target bundleno = 13 (0xd), region = 133 }
 0x1ba   :  { %706 = vsyncpa [#allocation3], 1 }
 0x1bb   :  { %708 = vsyncpa [#allocation3 + $0x1], 1 }
 0x1bc   :  { %709 = vsyncpa [#allocation6], 1 }
 0x1bd   :  { %710 = vsyncpa [#allocation4], 1 }
 0x1be   :  { %712 = vsyncpa [#allocation4 + $0x1], 1 }
 0x1bf   :  { %713 = vsyncpa [#allocation10], 1 }
 0x1c0   :  { %715 = vsyncpa [#allocation10 + $0x1], 1 }

</bundles_post_ra>
